<compile_context>
chip_gen: v5e
topology: v5e:2x2
jax: 0.10.0
libtpu: 0.0.40
codegen_flags: <defaults>
</compile_context>

<pallas_src>
import functools
import math

import jax
import jax.numpy as jnp
from jax import lax
from jax.experimental import pallas as pl
from jax.experimental.pallas import tpu as pltpu


def _mhsa_kernel(x_ref, wqkv_ref, bqkv_ref, wfc_ref, bfc_ref, o_ref,
                 *, num_heads, depth):
    """One batch element per grid step.

    x_ref:    (1, S, D)   VMEM f32
    wqkv_ref: (D, 3*D)    VMEM bf16   [Wq.T/sqrt(depth) | Wk.T | Wv.T]
    bqkv_ref: (1, 3*D)    VMEM f32    [bq/sqrt(depth)   | bk   | bv  ]
    wfc_ref:  (D, D)      VMEM bf16   Wfc.T
    bfc_ref:  (1, D)      VMEM f32
    o_ref:    (1, S, D)   VMEM f32
    """
    x = x_ref[0]                                   # (S, D) f32
    s, d_model = x.shape

    # Fused QKV projection: one lane-dense MXU op, bf16 inputs, f32 accumulate.
    qkv = jnp.dot(x.astype(jnp.bfloat16), wqkv_ref[...],
                  preferred_element_type=jnp.float32) + bqkv_ref[...]   # (S, 3D)

    head_outs = []
    # Static unroll is fine at H=4 / depth=32; switch to lax.fori_loop with a
    # VMEM scratch accumulator if num_heads/depth grow (vreg pressure).
    for h in range(num_heads):
        lo = h * depth
        q = qkv[:, lo:lo + depth]                              # scale pre-folded
        k = qkv[:, d_model + lo:d_model + lo + depth]
        v = qkv[:, 2 * d_model + lo:2 * d_model + lo + depth]

        # logits[i, j] = q[i] . k[j]   (contraction spec, no explicit transpose)
        logits = lax.dot_general(
            q.astype(jnp.bfloat16), k.astype(jnp.bfloat16),
            dimension_numbers=(((1,), (1,)), ((), ())),
            preferred_element_type=jnp.float32)                # (S, S) f32

        logits = logits - jnp.max(logits, axis=-1, keepdims=True)
        p = jnp.exp(logits)
        attn = p / jnp.sum(p, axis=-1, keepdims=True)          # exact softmax

        head_outs.append(
            jnp.dot(attn.astype(jnp.bfloat16), v.astype(jnp.bfloat16),
                    preferred_element_type=jnp.float32))       # (S, depth)

    # Re-assemble heads into the full D lanes, then one (S,D)x(D,D) matmul with
    # the un-split fc_out weight (matches torch's concat-then-Linear exactly).
    o_cat = jnp.concatenate(head_outs, axis=-1)                # (S, D) f32
    out = jnp.dot(o_cat.astype(jnp.bfloat16), wfc_ref[...],
                  preferred_element_type=jnp.float32) + bfc_ref[...]
    o_ref[0] = out.astype(o_ref.dtype)


def multi_head_self_attention(x, params, *, num_heads):
    """Pallas implementation of MultiHeadSelfAttention.forward."""
    B, S, D = x.shape
    assert D % num_heads == 0, "d_model must be divisible by num_heads"
    depth = D // num_heads

    kernel = functools.partial(_mhsa_kernel, num_heads=num_heads, depth=depth)
    rep2 = lambda b: (0, 0)                  # replicated (full-array) blocks

    flops = B * (2 * S * D * (3 * D)                 # fused qkv projection
                 + num_heads * 4 * S * S * depth     # q.k^T and attn.v
                 + 2 * S * D * D)                    # fc_out
    transcendentals = B * num_heads * S * S          # exp
    bytes_accessed = (x.size * 4 + params["wqkv"].size * 2 + params["bqkv"].size * 4
                      + params["wfc"].size * 2 + params["bfc"].size * 4
                      + B * S * D * 4)

    return pl.pallas_call(
        kernel,
        out_shape=jax.ShapeDtypeStruct((B, S, D), x.dtype),
        grid=(B,),
        in_specs=[
            pl.BlockSpec((1, S, D), lambda b: (b, 0, 0)),
            pl.BlockSpec((D, 3 * D), rep2),
            pl.BlockSpec((1, 3 * D), rep2),
            pl.BlockSpec((D, D), rep2),
            pl.BlockSpec((1, D), rep2),
        ],
        out_specs=pl.BlockSpec((1, S, D), lambda b: (b, 0, 0)),
        compiler_params=pltpu.CompilerParams(
            dimension_semantics=("parallel",),
            vmem_limit_bytes=8 * 1024 * 1024,
        ),
        cost_estimate=pl.CostEstimate(
            flops=int(flops), transcendentals=int(transcendentals),
            bytes_accessed=int(bytes_accessed)),
    )(x, params["wqkv"], params["bqkv"], params["wfc"], params["bfc"])


def prepack_params(torch_style, num_heads):
    """Re-lay out PyTorch-convention Linear weights for the kernel.

    torch Linear computes y = x @ W.T + b with W of shape (out, in).
    Packs [Wq.T | Wk.T | Wv.T] into one (D, 3D) slab (Wq/bq pre-scaled by
    1/sqrt(depth)), keeps Wfc.T un-split, and casts matmul weights to bf16.
    Biases stay f32 (added after the f32-accumulated matmuls).
    """
    Wq, bq = torch_style["Wq"], torch_style["bq"]
    Wk, bk = torch_style["Wk"], torch_style["bk"]
    Wv, bv = torch_style["Wv"], torch_style["bv"]
    Wfc, bfc = torch_style["Wfc"], torch_style["bfc"]
    D = Wq.shape[0]
    depth = D // num_heads
    scale = 1.0 / math.sqrt(depth)

    wqkv = jnp.concatenate([Wq.T * scale, Wk.T, Wv.T], axis=1)      # (D, 3D)
    bqkv = jnp.concatenate([bq * scale, bk, bv]).reshape(1, 3 * D)  # (1, 3D)
    return {
        "wqkv": wqkv.astype(jnp.bfloat16),
        "bqkv": bqkv.astype(jnp.float32),
        "wfc": Wfc.T.astype(jnp.bfloat16),                          # (D, D)
        "bfc": bfc.reshape(1, D).astype(jnp.float32),
    }


def _reference(x, torch_style, num_heads):
    """Pure-JAX mirror of the PyTorch forward (f32, for validation)."""
    Wq, bq = torch_style["Wq"], torch_style["bq"]
    Wk, bk = torch_style["Wk"], torch_style["bk"]
    Wv, bv = torch_style["Wv"], torch_style["bv"]
    Wfc, bfc = torch_style["Wfc"], torch_style["bfc"]
    B, S, D = x.shape
    depth = D // num_heads

    def proj(W, b):
        y = x @ W.T + b
        return y.reshape(B, S, num_heads, depth).transpose(0, 2, 1, 3)

    q, k, v = proj(Wq, bq), proj(Wk, bk), proj(Wv, bv)
    attn = jnp.einsum("bhqd,bhkd->bhqk", q, k) / math.sqrt(depth)
    attn = jax.nn.softmax(attn, axis=-1)
    o = jnp.einsum("bhqk,bhkd->bhqd", attn, v)
    o = o.transpose(0, 2, 1, 3).reshape(B, S, D)
    return o @ Wfc.T + bfc


def _init_torch_style(key, d_model):
    """nn.Linear default init: U(-1/sqrt(in), 1/sqrt(in)) for W and b."""
    bound = 1.0 / math.sqrt(d_model)
    keys = jax.random.split(key, 8)

    def lin(kw, kb):
        W = jax.random.uniform(kw, (d_model, d_model), jnp.float32, -bound, bound)
        b = jax.random.uniform(kb, (d_model,), jnp.float32, -bound, bound)
        return W, b

    Wq, bq = lin(keys[0], keys[1])
    Wk, bk = lin(keys[2], keys[3])
    Wv, bv = lin(keys[4], keys[5])
    Wfc, bfc = lin(keys[6], keys[7])
    return {"Wq": Wq, "bq": bq, "Wk": Wk, "bk": bk,
            "Wv": Wv, "bv": bv, "Wfc": Wfc, "bfc": bfc}


if __name__ == "__main__":
    # Small shapes consistent with the module: batch=2, seq=16, d_model=128,
    # num_heads=4 (depth=32). d_model=128 keeps all matmuls lane-dense.
    B, S, D, H = 2, 16, 128, 4

    key = jax.random.PRNGKey(0)
    k_x, k_p = jax.random.split(key)
    x = jax.random.normal(k_x, (B, S, D), jnp.float32)

    torch_style = _init_torch_style(k_p, D)
    params = prepack_params(torch_style, H)

    out = multi_head_self_attention(x, params, num_heads=H)
    out = jax.block_until_ready(out)

    ref = _reference(x, torch_style, H)
    assert out.shape == (B, S, D)
    # Tolerance reflects bf16 MXU inputs (f32 accumulation, f32 softmax).
    assert jnp.allclose(out, ref, atol=3e-2, rtol=3e-2), (
        "mismatch vs pure-JAX reference, max abs err = "
        f"{float(jnp.max(jnp.abs(out - ref)))}")

    print("KERNEL_OK")
</pallas_src>

<mosaic_0001>
module attributes {stable_mosaic.version = 11 : i64} {
  func.func @_mhsa_kernel(%arg0: i32, %arg1: memref<1x16x128xf32, #tpu.memory_space<vmem>>, %arg2: memref<128x384xbf16, #tpu.memory_space<vmem>>, %arg3: memref<1x384xf32, #tpu.memory_space<vmem>>, %arg4: memref<128x128xbf16, #tpu.memory_space<vmem>>, %arg5: memref<1x128xf32, #tpu.memory_space<vmem>>, %arg6: memref<1x16x128xf32, #tpu.memory_space<vmem>>) attributes {dimension_semantics = [#tpu.dimension_semantics<parallel>], iteration_bounds = array<i64: 2>, scalar_prefetch = 0 : i64, scratch_operands = 0 : i64, tpu.core_type = #tpu.core_type<tc>, window_params = [{transform_indices = @transform_0, window_bounds = array<i64: 1, 16, 128>}, {pipeline_mode = #tpu.pipeline_mode<synchronous>, transform_indices = @transform_1, window_bounds = array<i64: 128, 384>}, {pipeline_mode = #tpu.pipeline_mode<synchronous>, transform_indices = @transform_2, window_bounds = array<i64: 1, 384>}, {pipeline_mode = #tpu.pipeline_mode<synchronous>, transform_indices = @transform_3, window_bounds = array<i64: 128, 128>}, {pipeline_mode = #tpu.pipeline_mode<synchronous>, transform_indices = @transform_4, window_bounds = array<i64: 1, 128>}, {transform_indices = @transform_5, window_bounds = array<i64: 1, 16, 128>}]} {
    %c0 = arith.constant 0 : index
    %c0_0 = arith.constant 0 : index
    %c0_1 = arith.constant 0 : index
    %0 = vector.load %arg1[%c0, %c0_0, %c0_1] : memref<1x16x128xf32, #tpu.memory_space<vmem>>, vector<1x16x128xf32>
    %1 = vector.shape_cast %0 : vector<1x16x128xf32> to vector<16x128xf32>
    %2 = arith.truncf %1 : vector<16x128xf32> to vector<16x128xbf16>
    %c0_2 = arith.constant 0 : index
    %c0_3 = arith.constant 0 : index
    %3 = vector.load %arg2[%c0_2, %c0_3] : memref<128x384xbf16, #tpu.memory_space<vmem>>, vector<128x384xbf16>
    %cst = arith.constant dense<0.000000e+00> : vector<16x384xf32>
    %4 = tpu.matmul %2, %3, %cst {dimension_numbers = #tpu.dot_dimension_numbers<[1], [0], [0], [1], [0, 0, 1, 1], [], []>} : vector<16x128xbf16>, vector<128x384xbf16>, vector<16x384xf32> -> vector<16x384xf32>
    %c0_4 = arith.constant 0 : index
    %c0_5 = arith.constant 0 : index
    %5 = vector.load %arg3[%c0_4, %c0_5] : memref<1x384xf32, #tpu.memory_space<vmem>>, vector<1x384xf32>
    %6 = vector.broadcast %5 : vector<1x384xf32> to vector<16x384xf32>
    %7 = arith.addf %4, %6 : vector<16x384xf32>
    %8 = vector.extract_strided_slice %7 {offsets = [0, 0], sizes = [16, 32], strides = [1, 1]} : vector<16x384xf32> to vector<16x32xf32>
    %9 = vector.extract_strided_slice %7 {offsets = [0, 128], sizes = [16, 32], strides = [1, 1]} : vector<16x384xf32> to vector<16x32xf32>
    %10 = vector.extract_strided_slice %7 {offsets = [0, 256], sizes = [16, 32], strides = [1, 1]} : vector<16x384xf32> to vector<16x32xf32>
    %11 = arith.truncf %8 : vector<16x32xf32> to vector<16x32xbf16>
    %12 = arith.truncf %9 : vector<16x32xf32> to vector<16x32xbf16>
    %cst_6 = arith.constant dense<0.000000e+00> : vector<16x16xf32>
    %13 = tpu.matmul %11, %12, %cst_6 {dimension_numbers = #tpu.dot_dimension_numbers<[1], [1], [0], [0], [0, 0, 1, 0], [], []>} : vector<16x32xbf16>, vector<16x32xbf16>, vector<16x16xf32> -> vector<16x16xf32>
    %cst_7 = arith.constant dense<0xFF800000> : vector<16xf32>
    %14 = vector.multi_reduction <maximumf>, %13, %cst_7 [1] : vector<16x16xf32> to vector<16xf32>
    %15 = vector.shape_cast %14 : vector<16xf32> to vector<16x1xf32>
    %16 = vector.broadcast %15 : vector<16x1xf32> to vector<16x16xf32>
    %17 = arith.subf %13, %16 : vector<16x16xf32>
    %18 = math.exp %17 : vector<16x16xf32>
    %cst_8 = arith.constant dense<0.000000e+00> : vector<16xf32>
    %19 = vector.multi_reduction <add>, %18, %cst_8 [1] : vector<16x16xf32> to vector<16xf32>
    %20 = vector.shape_cast %19 : vector<16xf32> to vector<16x1xf32>
    %21 = vector.broadcast %20 : vector<16x1xf32> to vector<16x16xf32>
    %22 = arith.divf %18, %21 : vector<16x16xf32>
    %23 = arith.truncf %22 : vector<16x16xf32> to vector<16x16xbf16>
    %24 = arith.truncf %10 : vector<16x32xf32> to vector<16x32xbf16>
    %cst_9 = arith.constant dense<0.000000e+00> : vector<16x32xf32>
    %25 = tpu.matmul %23, %24, %cst_9 {dimension_numbers = #tpu.dot_dimension_numbers<[1], [0], [0], [1], [0, 0, 1, 1], [], []>} : vector<16x16xbf16>, vector<16x32xbf16>, vector<16x32xf32> -> vector<16x32xf32>
    %26 = vector.extract_strided_slice %7 {offsets = [0, 32], sizes = [16, 32], strides = [1, 1]} : vector<16x384xf32> to vector<16x32xf32>
    %27 = vector.extract_strided_slice %7 {offsets = [0, 160], sizes = [16, 32], strides = [1, 1]} : vector<16x384xf32> to vector<16x32xf32>
    %28 = vector.extract_strided_slice %7 {offsets = [0, 288], sizes = [16, 32], strides = [1, 1]} : vector<16x384xf32> to vector<16x32xf32>
    %29 = arith.truncf %26 : vector<16x32xf32> to vector<16x32xbf16>
    %30 = arith.truncf %27 : vector<16x32xf32> to vector<16x32xbf16>
    %cst_10 = arith.constant dense<0.000000e+00> : vector<16x16xf32>
    %31 = tpu.matmul %29, %30, %cst_10 {dimension_numbers = #tpu.dot_dimension_numbers<[1], [1], [0], [0], [0, 0, 1, 0], [], []>} : vector<16x32xbf16>, vector<16x32xbf16>, vector<16x16xf32> -> vector<16x16xf32>
    %cst_11 = arith.constant dense<0xFF800000> : vector<16xf32>
    %32 = vector.multi_reduction <maximumf>, %31, %cst_11 [1] : vector<16x16xf32> to vector<16xf32>
    %33 = vector.shape_cast %32 : vector<16xf32> to vector<16x1xf32>
    %34 = vector.broadcast %33 : vector<16x1xf32> to vector<16x16xf32>
    %35 = arith.subf %31, %34 : vector<16x16xf32>
    %36 = math.exp %35 : vector<16x16xf32>
    %cst_12 = arith.constant dense<0.000000e+00> : vector<16xf32>
    %37 = vector.multi_reduction <add>, %36, %cst_12 [1] : vector<16x16xf32> to vector<16xf32>
    %38 = vector.shape_cast %37 : vector<16xf32> to vector<16x1xf32>
    %39 = vector.broadcast %38 : vector<16x1xf32> to vector<16x16xf32>
    %40 = arith.divf %36, %39 : vector<16x16xf32>
    %41 = arith.truncf %40 : vector<16x16xf32> to vector<16x16xbf16>
    %42 = arith.truncf %28 : vector<16x32xf32> to vector<16x32xbf16>
    %cst_13 = arith.constant dense<0.000000e+00> : vector<16x32xf32>
    %43 = tpu.matmul %41, %42, %cst_13 {dimension_numbers = #tpu.dot_dimension_numbers<[1], [0], [0], [1], [0, 0, 1, 1], [], []>} : vector<16x16xbf16>, vector<16x32xbf16>, vector<16x32xf32> -> vector<16x32xf32>
    %44 = vector.extract_strided_slice %7 {offsets = [0, 64], sizes = [16, 32], strides = [1, 1]} : vector<16x384xf32> to vector<16x32xf32>
    %45 = vector.extract_strided_slice %7 {offsets = [0, 192], sizes = [16, 32], strides = [1, 1]} : vector<16x384xf32> to vector<16x32xf32>
    %46 = vector.extract_strided_slice %7 {offsets = [0, 320], sizes = [16, 32], strides = [1, 1]} : vector<16x384xf32> to vector<16x32xf32>
    %47 = arith.truncf %44 : vector<16x32xf32> to vector<16x32xbf16>
    %48 = arith.truncf %45 : vector<16x32xf32> to vector<16x32xbf16>
    %cst_14 = arith.constant dense<0.000000e+00> : vector<16x16xf32>
    %49 = tpu.matmul %47, %48, %cst_14 {dimension_numbers = #tpu.dot_dimension_numbers<[1], [1], [0], [0], [0, 0, 1, 0], [], []>} : vector<16x32xbf16>, vector<16x32xbf16>, vector<16x16xf32> -> vector<16x16xf32>
    %cst_15 = arith.constant dense<0xFF800000> : vector<16xf32>
    %50 = vector.multi_reduction <maximumf>, %49, %cst_15 [1] : vector<16x16xf32> to vector<16xf32>
    %51 = vector.shape_cast %50 : vector<16xf32> to vector<16x1xf32>
    %52 = vector.broadcast %51 : vector<16x1xf32> to vector<16x16xf32>
    %53 = arith.subf %49, %52 : vector<16x16xf32>
    %54 = math.exp %53 : vector<16x16xf32>
    %cst_16 = arith.constant dense<0.000000e+00> : vector<16xf32>
    %55 = vector.multi_reduction <add>, %54, %cst_16 [1] : vector<16x16xf32> to vector<16xf32>
    %56 = vector.shape_cast %55 : vector<16xf32> to vector<16x1xf32>
    %57 = vector.broadcast %56 : vector<16x1xf32> to vector<16x16xf32>
    %58 = arith.divf %54, %57 : vector<16x16xf32>
    %59 = arith.truncf %58 : vector<16x16xf32> to vector<16x16xbf16>
    %60 = arith.truncf %46 : vector<16x32xf32> to vector<16x32xbf16>
    %cst_17 = arith.constant dense<0.000000e+00> : vector<16x32xf32>
    %61 = tpu.matmul %59, %60, %cst_17 {dimension_numbers = #tpu.dot_dimension_numbers<[1], [0], [0], [1], [0, 0, 1, 1], [], []>} : vector<16x16xbf16>, vector<16x32xbf16>, vector<16x32xf32> -> vector<16x32xf32>
    %62 = vector.extract_strided_slice %7 {offsets = [0, 96], sizes = [16, 32], strides = [1, 1]} : vector<16x384xf32> to vector<16x32xf32>
    %63 = vector.extract_strided_slice %7 {offsets = [0, 224], sizes = [16, 32], strides = [1, 1]} : vector<16x384xf32> to vector<16x32xf32>
    %64 = vector.extract_strided_slice %7 {offsets = [0, 352], sizes = [16, 32], strides = [1, 1]} : vector<16x384xf32> to vector<16x32xf32>
    %65 = arith.truncf %62 : vector<16x32xf32> to vector<16x32xbf16>
    %66 = arith.truncf %63 : vector<16x32xf32> to vector<16x32xbf16>
    %cst_18 = arith.constant dense<0.000000e+00> : vector<16x16xf32>
    %67 = tpu.matmul %65, %66, %cst_18 {dimension_numbers = #tpu.dot_dimension_numbers<[1], [1], [0], [0], [0, 0, 1, 0], [], []>} : vector<16x32xbf16>, vector<16x32xbf16>, vector<16x16xf32> -> vector<16x16xf32>
    %cst_19 = arith.constant dense<0xFF800000> : vector<16xf32>
    %68 = vector.multi_reduction <maximumf>, %67, %cst_19 [1] : vector<16x16xf32> to vector<16xf32>
    %69 = vector.shape_cast %68 : vector<16xf32> to vector<16x1xf32>
    %70 = vector.broadcast %69 : vector<16x1xf32> to vector<16x16xf32>
    %71 = arith.subf %67, %70 : vector<16x16xf32>
    %72 = math.exp %71 : vector<16x16xf32>
    %cst_20 = arith.constant dense<0.000000e+00> : vector<16xf32>
    %73 = vector.multi_reduction <add>, %72, %cst_20 [1] : vector<16x16xf32> to vector<16xf32>
    %74 = vector.shape_cast %73 : vector<16xf32> to vector<16x1xf32>
    %75 = vector.broadcast %74 : vector<16x1xf32> to vector<16x16xf32>
    %76 = arith.divf %72, %75 : vector<16x16xf32>
    %77 = arith.truncf %76 : vector<16x16xf32> to vector<16x16xbf16>
    %78 = arith.truncf %64 : vector<16x32xf32> to vector<16x32xbf16>
    %cst_21 = arith.constant dense<0.000000e+00> : vector<16x32xf32>
    %79 = tpu.matmul %77, %78, %cst_21 {dimension_numbers = #tpu.dot_dimension_numbers<[1], [0], [0], [1], [0, 0, 1, 1], [], []>} : vector<16x16xbf16>, vector<16x32xbf16>, vector<16x32xf32> -> vector<16x32xf32>
    %80 = tpu.concatenate %25, %43, %61, %79 in 1 : vector<16x32xf32>, vector<16x32xf32>, vector<16x32xf32>, vector<16x32xf32> -> vector<16x128xf32>
    %81 = arith.truncf %80 : vector<16x128xf32> to vector<16x128xbf16>
    %c0_22 = arith.constant 0 : index
    %c0_23 = arith.constant 0 : index
    %82 = vector.load %arg4[%c0_22, %c0_23] : memref<128x128xbf16, #tpu.memory_space<vmem>>, vector<128x128xbf16>
    %cst_24 = arith.constant dense<0.000000e+00> : vector<16x128xf32>
    %83 = tpu.matmul %81, %82, %cst_24 {dimension_numbers = #tpu.dot_dimension_numbers<[1], [0], [0], [1], [0, 0, 1, 1], [], []>} : vector<16x128xbf16>, vector<128x128xbf16>, vector<16x128xf32> -> vector<16x128xf32>
    %c0_25 = arith.constant 0 : index
    %c0_26 = arith.constant 0 : index
    %84 = vector.load %arg5[%c0_25, %c0_26] : memref<1x128xf32, #tpu.memory_space<vmem>>, vector<1x128xf32>
    %85 = vector.broadcast %84 : vector<1x128xf32> to vector<16x128xf32>
    %86 = arith.addf %83, %85 : vector<16x128xf32>
    %c0_27 = arith.constant 0 : index
    %c0_28 = arith.constant 0 : index
    %c0_29 = arith.constant 0 : index
    %87 = vector.load %arg6[%c0_27, %c0_28, %c0_29] : memref<1x16x128xf32, #tpu.memory_space<vmem>>, vector<1x16x128xf32>
    %88 = vector.shape_cast %87 : vector<1x16x128xf32> to vector<16x128xf32>
    %89 = vector.shape_cast %86 : vector<16x128xf32> to vector<1x16x128xf32>
    tpu.vector_store %arg6[%c0_27, %c0_28, %c0_29], %89 {strides = array<i32>} : memref<1x16x128xf32, #tpu.memory_space<vmem>>, vector<1x16x128xf32>,
    return
  }
  func.func @transform_0(%arg0: i32) -> (i32, i32, i32) {
    %c0_i32 = arith.constant 0 : i32
    %c0_i32_0 = arith.constant 0 : i32
    %c0_i32_1 = arith.constant 0 : i32
    return %arg0, %c0_i32, %c0_i32_0 : i32, i32, i32
  }
  func.func @transform_1(%arg0: i32) -> (i32, i32) {
    %c0_i32 = arith.constant 0 : i32
    %c0_i32_0 = arith.constant 0 : i32
    %c0_i32_1 = arith.constant 0 : i32
    return %c0_i32, %c0_i32_0 : i32, i32
  }
  func.func @transform_2(%arg0: i32) -> (i32, i32) {
    %c0_i32 = arith.constant 0 : i32
    %c0_i32_0 = arith.constant 0 : i32
    %c0_i32_1 = arith.constant 0 : i32
    return %c0_i32, %c0_i32_0 : i32, i32
  }
  func.func @transform_3(%arg0: i32) -> (i32, i32) {
    %c0_i32 = arith.constant 0 : i32
    %c0_i32_0 = arith.constant 0 : i32
    %c0_i32_1 = arith.constant 0 : i32
    return %c0_i32, %c0_i32_0 : i32, i32
  }
  func.func @transform_4(%arg0: i32) -> (i32, i32) {
    %c0_i32 = arith.constant 0 : i32
    %c0_i32_0 = arith.constant 0 : i32
    %c0_i32_1 = arith.constant 0 : i32
    return %c0_i32, %c0_i32_0 : i32, i32
  }
  func.func @transform_5(%arg0: i32) -> (i32, i32, i32) {
    %c0_i32 = arith.constant 0 : i32
    %c0_i32_0 = arith.constant 0 : i32
    %c0_i32_1 = arith.constant 0 : i32
    return %arg0, %c0_i32, %c0_i32_0 : i32, i32, i32
  }
}

</mosaic_0001>

<bundles_post_ra>
// kernel: tpu_custom_call.1
= control target key start
LH: loop header
LB: loop body
LE: loop exit
PB: predicated region body
PF: predicated region fallthrough
CT: control target
= control target key end

     0   :  { %10 = vsyncpa [#allocation3], 0  ;;  %s1978_s0 = inlined_call_operand.hbm [shape: f32[2,16,128], index: 0, kind: input, shape index: {}]   ;;  %s1979_s1 = inlined_call_operand.hbm [shape: bf16[128,384], index: 1, kind: input, shape index: {}]   ;;  %s1980_s2 = inlined_call_operand.hbm [shape: f32[1,384], index: 2, kind: input, shape index: {}]   ;;  %s1981_s3 = inlined_call_operand.hbm [shape: bf16[128,128], index: 3, kind: input, shape index: {}]   ;;  %s1982_s4 = inlined_call_operand.vmem [shape: f32[1,128], index: 4, kind: input, shape index: {}]   ;;  %s1983_s5 = inlined_call_operand.hbm [shape: f32[2,16,128], index: 5, kind: output, shape index: {}]  }
   0x1   :  { %12 = vsyncpa [#allocation3 + $0x1], 0 }
   0x2   :  { %13 = vsyncpa [#allocation6], 0 }
   0x3   :  { %14 = vsyncpa [#allocation9], 0 }
   0x4   :  { %15 = vsyncpa [#allocation4], 0 }
   0x5   :  { %17 = vsyncpa [#allocation4 + $0x1], 0  ;;  %s1681_s18 = smov 0   ;;  %s1683_s19 = smov 0  }
   0x6   :  { %s1685_s20 = smov 0   ;;  %s1687_s21 = smov 0  }
   0x7 LB: > { %s1702_s22 = sadd.s32 4294967295, %s1635_s21   ;;  %s1115_s23 = sadd.s32 4294967294, %s1635_s21   ;;  %s1635_s21 = sphi %s1687_s21, %s2000_s21   ;;  %s1631_s20 = sphi %s1685_s20, %s1999_s20   ;;  %s1627_s19 = sphi %s1683_s19, %s1998_s19   ;;  %s1623_s18 = sphi %s1681_s18, %s1997_s18  }
   0x8   : > { %p43_p0 = scmp.ne.s32.totalorder %s1627_s19, %s1623_s18  ;;  %p44_p1 = scmp.eq.s32.totalorder %s1702_s22, 0 }
   0x9   : > { %p151_p2 = scmp.eq.s32.totalorder %s1702_s22, 1  ;;  %p157_p3 = scmp.eq.s32.totalorder %s1115_s23, 1 }
   0xa   : > { %p1711_p4 = por %p44_p1, %p43_p0  ;;  %p1116_p5 = scmp.ge.s32.totalorder %s1635_s21, 1 }
   0xb   : > { %p1716_p6 = por %p157_p3, %p43_p0  ;;  %p164_p7 = scmp.lt.s32.totalorder %s1635_s21, 3 }
   0xc   : > { %s175_s28 = sshll.u32 %s1979_s1, 4  ;;  %s1637_s30 = smov [#allocation5]   ;;  %s176_s28 = int_to_ptr.hbm [resolvable:$true] %s175_s28 }
   0xd   : > { %p1724_p8 = pnand %p1116_p5, %p164_p7  ;;  %s177_s6 = sshll.u32 %s1637_s30, 4  ;;  %s178_s6 = int_to_ptr.vmem [resolvable:$true] %s177_s6 }
   0xe   : > { %s190_s10 = sshll.u32 %s1980_s2, 4  ;;  %s1638_s11 = smov 192   ;;  %s191_s10 = int_to_ptr.hbm [resolvable:$true] %s190_s10 }
   0xf   : > { %p1321_p9 = pneg %p1724_p8  ;;  %s1639_s12 = smov 12  }
  0x10   : > { %s1640_s13 = smov [#allocation7]   ;;  %s201_s17 = sshll.u32 %s1981_s3, 4  ;;  %s202_s17 = int_to_ptr.hbm [resolvable:$true] %s201_s17 }
  0x11   : > { %p1732_p10 = pnand %p1321_p9, %p44_p1  ;;  %s192_s14 = sshll.u32 %s1640_s13, 4  ;;  %s193_s14 = int_to_ptr.vmem [resolvable:$true] %s192_s14 }
  0x12   : > { %s1641_s23 = smov [#allocation8]   ;;  %s1642_s27 = smov 64  }
  0x13   : > { %1324 = dma.hbm_to_vmem [thread:$0]  (!%p1732_p10), %s176_s28, 3072, %s178_s6, [#allocation6], %s1638_s11, %s1638_s11, %s1639_s12  }
  0x14   : > { %1327 = dma.hbm_to_vmem [thread:$0]  (!%p1732_p10), %s191_s10, 48, %s193_s14, [#allocation6]  }
  0x15   : > { %s203_s26 = sshll.u32 %s1641_s23, 4  ;;  %s1643_s28 = smov 4   ;;  %s204_s26 = int_to_ptr.vmem [resolvable:$true] %s203_s26 }
  0x16   : > { %1330 = dma.hbm_to_vmem [thread:$0]  (!%p1732_p10), %s202_s17, 1024, %s204_s26, [#allocation9], %s1642_s27, %s1642_s27, %s1643_s28  }
  0x17   : > { %s1750_s30 = sadd.s32 1, %s1635_s21   ;;  %s30_s8 = sadd.s32 1, %s1631_s20 }
  0x18   : > { %s27_s6 = ssub.s32 %s1635_s21, %s1750_s30  ;;  %p37_p13 = scmp.ne.s32.totalorder %s1631_s20, %s1627_s19 }
  0x19   : > { %p28_p12 = scmp.eq.s32.totalorder %s27_s6, 0  ;;  %p38_p0 = scmp.eq.s32.totalorder %s1635_s21, 0 }
  0x1a   : > { %p1342_p3 = scmp.lt.s32.totalorder %s1635_s21, 2  ;;  %p1764_p7 = por %p151_p2, %p37_p13 }
  0x1b   : > { %s1760_s9 = scalar_select %p28_p12, %s1631_s20, %s30_s8  }
  0x1c   : > { %p39_p5 = por %p38_p0, %p37_p13  ;;  %s220_s7 = sand.u32 1, %s1631_s20  }
  0x1d   : > { %s1271_s11 = sshll.u32 %s1635_s21, 4  ;;  %s1121_s12 = sshll.u32 %s220_s7, 4 }
  0x1e   : > { %s229_s15 = scalar_lea.hbm %s1978_s0, %s1271_s11  ;;  %s224_s17 = scalar_lea.vmem [#allocation2], %s1121_s12 }
  0x1f   : > { %s230_s16 = sshll.u32 %s229_s15, 4  ;;  %s232_s23 = sshll.u32 %s224_s17, 4  ;;  %s231_s16 = int_to_ptr.hbm [resolvable:$true] %s230_s16  ;;  %s233_s23 = int_to_ptr.vmem [resolvable:$true] %s232_s23 }
  0x20   : > { %p1775_p9 = pnand %p1342_p3, %p39_p5  ;;  %s221_s27 = scalar_lea.sflag [#allocation3], %s220_s7 }
  0x21   : > { %s1531_s28 = sshra.s32 %s231_s16, 4  ;;  %s1538_s12 = scalar_lea.hbm %s1978_s0, 32  ;;  %s1532_s28 = int_to_ptr.hbm [resolvable:$true] %s1531_s28 }
  0x22   : > { %s1533_s6 = scalar_lea.hbm %s1532_s28, 16  ;;  %p1535_p10 = pneg %p1775_p9 }
  0x23   : > { %p1534_p2 = scmp.ne.s32.totalorder %s1532_s28, %s1533_s6  ;;  %p1539_p0 = scmp.lt.s32.totalorder %s1532_s28, %s1978_s0 }
  0x24   : > { %p1540_p3 = scmp.lt.s32.totalorder %s1538_s12, %s1533_s6 }
  0x25   : > { %p1536_p12 = pnand %p1535_p10, %p1534_p2 }
  0x26   : > { %p1541_p5 = por %p1540_p3, %p1539_p0 }
  0x27   : > { %p1537_p13 = pneg %p1536_p12 }
  0x29   : > { %p1542_p11 = pnand %p1541_p5, %p1537_p13 }
  0x2b   : > { %1545 = shalt.err (!%p1542_p11)
}
  0x2c   : > { %s1644_s7 = smov 128   ;;  %s1645_s15 = smov 8  }
  0x2d   : > { %1334 = dma.hbm_to_vmem [thread:$0]  (!%p1775_p9), %s231_s16, 256, %s233_s23, %s221_s27, %s1644_s7, %s1644_s7, %s1645_s15  }
  0x2e   : > { %244 = sbr.rel (%p1724_p8) target bundleno = 1478 (0x5c6), region = 40  ;;  %s1792_s17 = sand.u32 (!%p1724_p8), 1, %s1627_s19  }
  0x2f   : > { %s1125_s28 = sshll.u32 (!%p1724_p8), %s1792_s17, 4  ;;  %s247_s6 = scalar_lea.sflag (!%p1724_p8), [#allocation3], %s1792_s17 }
  0x30   : > { %s1798_s8 = scalar_lea.vmem (!%p1724_p8), [#allocation2], %s1125_s28 }
  0x33   : > { %1606 = dma.done.wait (%p1711_p4), %s247_s6, 256  }
  0x34   : > { %1608 = vsyncadd (%p1711_p4), %s247_s6, 4294967040 }
  0x35   : > { %1610 = dma.done.wait (%p44_p1), [#allocation6], 3120  }
  0x36   : > { %1612 = vsyncadd (%p44_p1), [#allocation6], 4294964176 }
  0x37   : > { %1614 = dma.done.wait (%p44_p1), [#allocation9], 1024  }
  0x38   : > { %1616 = vsyncadd (%p44_p1), [#allocation9], 4294966272  ;;  %v1216_v0 = vld [vmem:[#allocation5 + $0xa8] sm:$0xf]  ;;  %v1294_v1 = vld [vmem:[#allocation5 + $0xb0] sm:$0xf0] }
  0x39   : > { %v1293_v2 = vld [vmem:[#allocation5 + $0xac] sm:$0xf]  ;;  %v1217_v3 = vor.u32 %v1294_v1, %v1216_v0  ;;  %v1218_v4 = vld [vmem:[#allocation5 + $0xb4] sm:$0xf0]  ;;  %v1204_v5 = vld [vmem:[#allocation5 + $0x90] sm:$0xf] }
  0x3a   : > { %v1291_v6 = vld [vmem:[#allocation5 + $0x98] sm:$0xf0]  ;;  %v1221_v7 = vor.u32 %v1293_v2, %v1218_v4  ;;  %v1290_v8 = vld [vmem:[#allocation5 + $0x94] sm:$0xf]  ;;  %v1206_v9 = vld [vmem:[#allocation5 + $0x9c] sm:$0xf0] }
  0x3b   : > { %465 = vmatpush.bf16.msra.mxu0 %v1217_v3  ;;  %v1205_v10 = vor.u32 %v1291_v6, %v1204_v5  ;;  %v1209_v11 = vor.u32 %v1290_v8, %v1206_v9  ;;  %v1192_v12 = vld [vmem:[#allocation5 + $0x78] sm:$0xf]  ;;  %v1288_v13 = vld [vmem:[#allocation5 + $0x80] sm:$0xf0]  ;;  %v1287_v14 = vld [vmem:[#allocation5 + $0x7c] sm:$0xf] }
  0x3c   : > { %479 = vmatpush.bf16.msra.mxu1 %v1221_v7  ;;  %v1194_v15 = vld [vmem:[#allocation5 + $0x84] sm:$0xf0]  ;;  %v1193_v16 = vor.u32 %v1288_v13, %v1192_v12  ;;  %v1180_v18 = vld [vmem:[#allocation5 + $0x60] sm:$0xf]  ;;  %v1285_v19 = vld [vmem:[#allocation5 + $0x68] sm:$0xf0] }
  0x3d   : > { %v1197_v17 = vor.u32 %v1287_v14, %v1194_v15  ;;  %v1284_v20 = vld [vmem:[#allocation5 + $0x64] sm:$0xf]  ;;  %v1182_v21 = vld [vmem:[#allocation5 + $0x6c] sm:$0xf0]  ;;  %v1181_v22 = vor.u32 %v1285_v19, %v1180_v18  ;;  %v1168_v23 = vld [vmem:[#allocation5 + $0x48] sm:$0xf] }
  0x3e   : > { %v1224_v24 = vld [vmem:[#allocation5 + $0xb0] sm:$0xf]  ;;  %v1295_v25 = vld [vmem:[#allocation5 + $0xb8] sm:$0xf0]  ;;  %v1185_v26 = vor.u32 %v1284_v20, %v1182_v21  ;;  %v1282_v27 = vld [vmem:[#allocation5 + $0x50] sm:$0xf0] }
  0x3f   : > { %466 = vmatpush.bf16.msra.mxu0 %v1205_v10  ;;  %v1225_v28 = vor.u32 %v1295_v25, %v1224_v24  ;;  %v1212_v29 = vld [vmem:[#allocation5 + $0x98] sm:$0xf]  ;;  %v1292_v30 = vld [vmem:[#allocation5 + $0xa0] sm:$0xf0]  ;;  %v1281_v31 = vld [vmem:[#allocation5 + $0x4c] sm:$0xf]  ;;  %v1169_v34 = vor.u32 %v1282_v27, %v1168_v23 }
  0x40   : > { %480 = vmatpush.bf16.msra.mxu1 %v1209_v11  ;;  %v1170_v32 = vld [vmem:[#allocation5 + $0x54] sm:$0xf0]  ;;  %v1213_v33 = vor.u32 %v1292_v30, %v1212_v29  ;;  %v1200_v35 = vld [vmem:[#allocation5 + $0x80] sm:$0xf]  ;;  %v1289_v36 = vld [vmem:[#allocation5 + $0x88] sm:$0xf0] }
  0x41   : > { %493 = vmatpush.bf16.msra.mxu2 %v1225_v28  ;;  %v1173_v37 = vor.u32 %v1281_v31, %v1170_v32  ;;  %v1156_v38 = vld [vmem:[#allocation5 + $0x30] sm:$0xf]  ;;  %v1279_v39 = vld [vmem:[#allocation5 + $0x38] sm:$0xf0]  ;;  %v1278_v40 = vld [vmem:[#allocation5 + $0x34] sm:$0xf]  ;;  %v1201_v42 = vor.u32 %v1289_v36, %v1200_v35 }
  0x42   : > { %v1158_v41 = vld [vmem:[#allocation5 + $0x3c] sm:$0xf0]  ;;  %v1157_v43 = vor.u32 %v1279_v39, %v1156_v38  ;;  %v1188_v44 = vld [vmem:[#allocation5 + $0x68] sm:$0xf]  ;;  %v1286_v45 = vld [vmem:[#allocation5 + $0x70] sm:$0xf0] }
  0x43   : > { %467 = vmatpush.bf16.msra.mxu0 %v1193_v16  ;;  %v1161_v46 = vor.u32 %v1278_v40, %v1158_v41  ;;  %v1144_v47 = vld [vmem:[#allocation5 + $0x18] sm:$0xf]  ;;  %v1276_v48 = vld [vmem:[#allocation5 + $0x20] sm:$0xf0]  ;;  %v1275_v49 = vld [vmem:[#allocation5 + $0x1c] sm:$0xf]  ;;  %v1189_v51 = vor.u32 %v1286_v45, %v1188_v44 }
  0x44   : > { %481 = vmatpush.bf16.msra.mxu1 %v1197_v17  ;;  %v1146_v50 = vld [vmem:[#allocation5 + $0x24] sm:$0xf0]  ;;  %v1145_v52 = vor.u32 %v1276_v48, %v1144_v47  ;;  %v1176_v53 = vld [vmem:[#allocation5 + $0x50] sm:$0xf]  ;;  %v1283_v54 = vld [vmem:[#allocation5 + $0x58] sm:$0xf0] }
  0x45   : > { %494 = vmatpush.bf16.msra.mxu2 %v1213_v33  ;;  %v1149_v55 = vor.u32 %v1275_v49, %v1146_v50  ;;  %v1132_v56 = vld [vmem:[#allocation5] sm:$0xf]  ;;  %v1273_v57 = vld [vmem:[#allocation5 + $0x8] sm:$0xf0]  ;;  %v1272_v58 = vld [vmem:[#allocation5 + $0x4] sm:$0xf]  ;;  %v1177_v61 = vor.u32 %v1283_v54, %v1176_v53 }
  0x46   : > { %v1134_v59 = vld [vmem:[#allocation5 + $0xc] sm:$0xf0]  ;;  %v1133_v62 = vor.u32 %v1273_v57, %v1132_v56  ;;  %v295_v63 = vld [vmem:[%s1798_s8 + $0x8] sm:$0xff]  ;;  %v1280_v1 = vld [vmem:[#allocation5 + $0x40] sm:$0xf0]  ;;  %vm509_vm0 = vcmask 261120  }
  0x47   : > { %468 = vmatpush.bf16.msra.mxu0 %v1181_v22  ;;  %v294_v60 = vld [vmem:[%s1798_s8] sm:$0xff]  ;;  %v1164_v0 = vld [vmem:[#allocation5 + $0x38] sm:$0xf]  ;;  %v1137_v2 = vor.u32 %v1272_v58, %v1134_v59  ;;  %v1277_v6 = vld [vmem:[#allocation5 + $0x28] sm:$0xf0]  ;;  %s1646_s24 = smov 96  }
  0x48   : > { %482 = vmatpush.bf16.msra.mxu1 %v1185_v26  ;;  %v296_v3 = vpack.c.bf16 %v295_v63, %v294_v60  ;;  %v1165_v4 = vor.u32 %v1280_v1, %v1164_v0  ;;  %v1152_v5 = vld [vmem:[#allocation5 + $0x20] sm:$0xf]  ;;  %v1140_v8 = vld [vmem:[#allocation5 + $0x8] sm:$0xf]  ;;  %v1274_v9 = vld [vmem:[#allocation5 + $0x10] sm:$0xf0] }
  0x49   : > { %495 = vmatpush.bf16.msra.mxu2 %v1201_v42  ;;  %v1153_v7 = vor.u32 %v1277_v6, %v1152_v5  ;;  %v1141_v10 = vor.u32 %v1274_v9, %v1140_v8  ;;  %v329_v12 = vld [vmem:[#allocation7] sm:$0x7]  ;;  %s1647_s29 = smov 64   ;;  %s1648_s16 = smov 32   ;;  %vm530_vm1 = vcmask 130048  }
  0x4a   : > { %v332_v14 = vperm.slane %v329_v12, 1  ;;  %v331_v18 = vperm.slane %v329_v12, 0  ;;  %v333_v26 = vperm.slane %v329_v12, 2  ;;  %s1304_s27 = sshll.u32 %s1702_s22, 4  ;;  %s292_s14 = scalar_lea.vmem [#allocation10], %s1125_s28 }
  0x4b   : > { %469 = vmatpush.bf16.msra.mxu0 %v1169_v34  ;;  %s1009_s13 = scalar_lea.hbm %s1983_s5, %s1304_s27  ;;  %s1010_s7 = sshll.u32 %s292_s14, 4  ;;  %s1011_s7 = int_to_ptr.vmem [resolvable:$true] %s1010_s7 }
  0x4c   : > { %483 = vmatpush.bf16.msra.mxu1 %v1173_v37  ;;  %s1012_s15 = sshll.u32 %s1009_s13, 4  ;;  %s998_s6 = scalar_lea.sflag [#allocation4], %s1792_s17  ;;  %s1013_s15 = int_to_ptr.hbm [resolvable:$true] %s1012_s15 }
  0x4d   : > { %496 = vmatpush.bf16.msra.mxu2 %v1189_v51  ;;  %s1575_s8 = sshra.s32 %s1013_s15, 4  ;;  %s1581_s28 = scalar_lea.hbm %s1983_s5, 32  ;;  %s1576_s8 = int_to_ptr.hbm [resolvable:$true] %s1575_s8 }
  0x4e   : > { %s1577_s22 = scalar_lea.hbm %s1576_s8, 16  ;;  %p1582_p11 = scmp.lt.s32.totalorder %s1576_s8, %s1983_s5 }
  0x4f   : > { %470 = vmatpush.bf16.msra.mxu0 %v1157_v43  ;;  %p1578_p1 = scmp.ne.s32.totalorder %s1576_s8, %s1577_s22  ;;  %p1583_p9 = scmp.lt.s32.totalorder %s1581_s28, %s1577_s22 }
  0x50   : > { %484 = vmatpush.bf16.msra.mxu1 %v1161_v46 }
  0x51   : > { %497 = vmatpush.bf16.msra.mxu2 %v1177_v61  ;;  %p1579_p4 = pnand %p1578_p1, %p1764_p7  ;;  %p1584_p2 = por %p1583_p9, %p1582_p11 }
  0x53   : > { %471 = vmatpush.bf16.msra.mxu0 %v1145_v52  ;;  %p1580_p8 = pneg %p1579_p4 }
  0x54   : > { %485 = vmatpush.bf16.msra.mxu1 %v1149_v55 }
  0x55   : > { %498 = vmatpush.bf16.msra.mxu2 %v1165_v4  ;;  %p1585_p10 = pnand %p1584_p2, %p1580_p8 }
  0x57   : > { %472 = vmatpush.bf16.msra.mxu0 %v1133_v62 }
  0x58   : > { %486 = vmatpush.bf16.msra.mxu1 %v1137_v2 }
  0x59   : > { %499 = vmatpush.bf16.msra.mxu2 %v1153_v7 }
  0x5a   : > { %473 = vmatmul.bf16.vlgmr.msra.gmra.mxu0 %v296_v3 }
  0x5b   : > { %487 = vmatmul.bf16.vlgmr.msra.gmra.mxu1 %v296_v3 }
  0x5d   : > { %500 = vmatpush.bf16.msra.mxu2 %v1141_v10 }
  0x60   : > { %501 = vmatmul.bf16.vlgmr.msra.gmra.mxu2 %v296_v3 }
  0xd7   : > { %v474_v13 = vpop.f32.mrf.mxu0 }
  0xd8   : > { %v488_v11 = vpop.f32.mrf.mxu1  ;;  %v475_v22 = vadd.f32 %v474_v13, %v331_v18 }
  0xd9   : > { %v489_v16 = vadd.f32 %v488_v11, %v332_v14 }
  0xdf   : > { %v476_v20 = vpop.f32.mrf.mxu0 }
  0xe0   : > { %v490_v15 = vpop.f32.mrf.mxu1  ;;  %v477_v23 = vadd.f32 %v476_v20, %v331_v18 }
  0xe1   : > { %v491_v17 = vadd.f32 %v490_v15, %v332_v14 }
  0xe2   : > { %v507_v25 = vpack.c.bf16 %v477_v23, %v475_v22 }
  0xe3   : > { %v508_v19 = vpack.c.bf16 %v491_v17, %v489_v16  ;;  %v502_v24 = vpop.f32.mrf.mxu2 }
  0xe4   : > { %v503_v27 = vadd.f32 %v502_v24, %v333_v26 }
  0xe5   : > { %602 = vrot.lane.b32.xlu2 %v508_v19, %s1646_s24  ;;  %v514_v21 = vsel %vm509_vm0, %v508_v19, 0 }
  0xe6   : > { %523 = vmatpush.bf16.xpose.msra.mxu3 %v514_v21 }
  0xeb   : > { %v504_v28 = vpop.f32.mrf.mxu2 }
  0xec   : > { %v505_v29 = vadd.f32 %v504_v28, %v333_v26 }
  0xed   : > { %599 = vrot.lane.b32.xlu2 %v507_v25, %s1646_s24  ;;  %1226 = vmatmul.msk.bf16.vlgmr.msra.gmra.mxu3 %vm509_vm0, %v507_v25 }
  0xee   : > { %v1818_v30 = vpack.c.bf16 %v505_v29, %v503_v27 }
  0xf0   : > { %591 = vmatpush.bf16.msrb.mxu3 %v1818_v30 }
  0xf5   : > { %694 = vrot.lane.b32.xlu2 %v507_v25, %s1647_s29 }
  0xfd   : > { %787 = vrot.lane.b32.xlu2 %v507_v25, %s1648_s16 }
 0x13f   : > { %v603_v31 = vpop.permute.xlu2 %602 }
 0x140   : > { %v608_v32 = vsel %vm509_vm0, %v603_v31, 0 }
 0x141   : > { %617 = vmatpush.bf16.xpose.msra.mxu3 %v608_v32 }
 0x147   : > { %v600_v47 = vpop.permute.xlu2 %599 }
 0x14f   : > { %v695_v50 = vpop.permute.xlu2 %694 }
 0x157   : > { %v788_v16 = vpop.permute.xlu2 %787 }
 0x170   : > { %v525_v33 = vpop.f32.mrf.mxu3 }
 0x171   : > { %v531_v34 = vsel %vm530_vm1, %v525_v33, -inf }
 0x172   : > { %532 = vmax.xlane.f32.xlu0 %v531_v34 }
 0x178   : > { %v527_v35 = vpop.f32.mrf.mxu3 }
 0x179   : > { %v534_v36 = vsel %vm530_vm1, %v527_v35, -inf }
 0x17a   : > { %535 = vmax.xlane.f32.xlu0 %v534_v36 }
 0x18e   : > { %696 = vrot.lane.b32.xlu0 %v508_v19, %s1647_s29 }
 0x1e5   : > { %v533_v37 = vpop.xlane.xlu0 %532 }
 0x1e6   : > { %v537_v38 = vsub.f32 %v525_v33, %v533_v37 }
 0x1e8   : > { %v539_v39 = vmul.f32 1.442695, %v537_v38 }
 0x1ea   : > { %1409 = vpow2.f32 %v539_v39 }
 0x1ed   : > { %v536_v40 = vpop.xlane.xlu0 %535 }
 0x1ee   : > { %v538_v41 = vsub.f32 %v527_v35, %v536_v40 }
 0x1f0   : > { %v1410_v42 = vpop.eup %1409  ;;  %v541_v43 = vmul.f32 1.442695, %v538_v41 }
 0x1f1   : > { %v543_v44 = vsel %vm530_vm1, %v1410_v42, 0.0 }
 0x1f2   : > { %1411 = vpow2.f32 %v541_v43  ;;  %544 = vadd.xlane.f32.xlu1 %v543_v44 }
 0x1f8   : > { %v1412_v45 = vpop.eup %1411 }
 0x1f9   : > { %v546_v46 = vsel %vm530_vm1, %v1412_v45, 0.0 }
 0x1fa   : > { %547 = vadd.xlane.f32.xlu1 %v546_v46 }
 0x200   : > { %v697_v48 = vpop.permute.xlu0 %696 }
 0x201   : > { %v702_v49 = vsel %vm509_vm0, %v697_v48, 0 }
 0x202   : > { %711 = vmatpush.bf16.xpose.msrb.mxu2 %v702_v49 }
 0x209   : > { %1230 = vmatmul.msk.bf16.vlgmr.msrb.gmra.mxu2 %vm509_vm0, %v695_v50 }
 0x213   : > { %789 = vrot.lane.b32.xlu1 %v508_v19, %s1648_s16 }
 0x265   : > { %v545_v51 = vpop.xlane.xlu1 %544 }
 0x266   : > { %1413 = vrcp.f32 %v545_v51  ;;  %v560_v60 = vand.u32 2147483648, %v545_v51  ;;  %vm554_vm3 = vweird.f32 %v545_v51  ;;  %v558_v61 = vand.u32 2147483647, %v545_v51 }
 0x268   : > { %v561_v3 = vor.u32 1.1754944e-38, %v560_v60  ;;  %vm559_vm6 = vcmp.eq.f32.partialorder %v558_v61, 8.507059e+37 }
 0x26c   : > { %v1414_v52 = vpop.eup %1413 }
 0x26d   : > { %v550_v53 = vmul.f32 %v1414_v52, %v545_v51  ;;  %v548_v54 = vpop.xlane.xlu1 %547  ;;  %vm555_vm2 = vweird.f32 %v1414_v52 }
 0x26e   : > { %1415 = vrcp.f32 %v548_v54  ;;  %vm556_vm4 = vmor %vm554_vm3, %vm555_vm2  ;;  %v575_v63 = vand.u32 2147483648, %v548_v54  ;;  %v573_v2 = vand.u32 2147483647, %v548_v54  ;;  %vm569_vm7 = vweird.f32 %v548_v54 }
 0x26f   : > { %v551_v55 = vsub.f32 1.0, %v550_v53 }
 0x270   : > { %v576_v5 = vor.u32 1.1754944e-38, %v575_v63  ;;  %vm574_vm9 = vcmp.eq.f32.partialorder %v573_v2, 8.507059e+37 }
 0x271   : > { %v552_v56 = vmul.f32 %v1414_v52, %v551_v55 }
 0x273   : > { %v553_v58 = vadd.f32 %v1414_v52, %v552_v56 }
 0x274   : > { %v1416_v57 = vpop.eup %1415 }
 0x275   : > { %v565_v59 = vmul.f32 %v1416_v57, %v548_v54  ;;  %v557_v0 = vsel %vm556_vm4, %v1414_v52, %v553_v58  ;;  %vm570_vm5 = vweird.f32 %v1416_v57 }
 0x276   : > { %vm571_vm8 = vmor %vm569_vm7, %vm570_vm5  ;;  %v562_v6 = vsel %vm559_vm6, %v561_v3, %v557_v0 }
 0x277   : > { %v566_v62 = vsub.f32 1.0, %v565_v59  ;;  %v563_v9 = vmul.f32 %v1410_v42, %v562_v6 }
 0x279   : > { %v567_v1 = vmul.f32 %v1416_v57, %v566_v62 }
 0x27b   : > { %v568_v4 = vadd.f32 %v1416_v57, %v567_v1 }
 0x27d   : > { %v572_v7 = vsel %vm571_vm8, %v1416_v57, %v568_v4 }
 0x27e   : > { %v577_v8 = vsel %vm574_vm9, %v576_v5, %v572_v7 }
 0x27f   : > { %v578_v10 = vmul.f32 %v1412_v45, %v577_v8 }
 0x281   : > { %v579_v11 = vpack.c.bf16 %v578_v10, %v563_v9 }
 0x283   : > { %1227 = vmatmul.msk.bf16.vlgmr.msrb.gmra.mxu3 %vm530_vm1, %v579_v11 }
 0x285   : > { %v790_v12 = vpop.permute.xlu1 %789 }
 0x286   : > { %v795_v13 = vsel %vm509_vm0, %v790_v12, 0 }
 0x287   : > { %804 = vmatpush.bf16.xpose.msrb.mxu3 %v795_v13 }
 0x28c   : > { %v713_v14 = vpop.f32.mrf.mxu2 }
 0x28d   : > { %v718_v15 = vsel %vm530_vm1, %v713_v14, -inf }
 0x28e   : > { %719 = vmax.xlane.f32.xlu1 %v718_v15 }
 0x293   : > { %1228 = vmatmul.msk.bf16.vlgmr.msra.gmra.mxu3 %vm509_vm0, %v600_v47 }
 0x294   : > { %v715_v21 = vpop.f32.mrf.mxu2 }
 0x295   : > { %v721_v24 = vsel %vm530_vm1, %v715_v21, -inf }
 0x2a3   : > { %1232 = vmatmul.msk.bf16.vlgmr.msrb.gmra.mxu3 %vm509_vm0, %v788_v16 }
 0x301   : > { %v720_v25 = vpop.xlane.xlu1 %719 }
 0x302   : > { %v724_v26 = vsub.f32 %v713_v14, %v720_v25 }
 0x304   : > { %v726_v29 = vmul.f32 1.442695, %v724_v26 }
 0x306   : > { %v1837_v17 = vpop.f32.mrf.mxu3  ;;  %1417 = vpow2.f32 %v726_v29 }
 0x30c   : > { %v1846_v33 = vpop.eup %1417 }
 0x30d   : > { %v730_v34 = vsel %vm530_vm1, %v1846_v33, 0.0 }
 0x30e   : > { %v1839_v18 = vpop.f32.mrf.mxu3 }
 0x316   : > { %v619_v19 = vpop.f32.mrf.mxu3 }
 0x317   : > { %v624_v20 = vsel %vm530_vm1, %v619_v19, -inf }
 0x318   : > { %625 = vmax.xlane.f32.xlu2 %v624_v20  ;;  %v1302_v20 = vld [vmem:[#allocation8 + $0x30] sm:$0xff] }
 0x31e   : > { %v621_v22 = vpop.f32.mrf.mxu3 }
 0x31f   : > { %v627_v23 = vsel %vm530_vm1, %v621_v22, -inf }
 0x320   : > { %628 = vmax.xlane.f32.xlu0 %v627_v23  ;;  %722 = vmax.xlane.f32.xlu2 %v721_v24 }
 0x326   : > { %v806_v27 = vpop.f32.mrf.mxu3 }
 0x327   : > { %v811_v28 = vsel %vm530_vm1, %v806_v27, -inf }
 0x328   : > { %812 = vmax.xlane.f32.xlu0 %v811_v28 }
 0x32e   : > { %v808_v31 = vpop.f32.mrf.mxu3 }
 0x32f   : > { %v814_v32 = vsel %vm530_vm1, %v808_v31, -inf }
 0x330   : > { %815 = vmax.xlane.f32.xlu2 %v814_v32 }
 0x338   : > { %731 = vadd.xlane.f32.xlu2 %v730_v34 }
 0x38b   : > { %v626_v35 = vpop.xlane.xlu2 %625 }
 0x38c   : > { %v630_v40 = vsub.f32 %v619_v19, %v626_v35 }
 0x38e   : > { %v632_v43 = vmul.f32 1.442695, %v630_v40 }
 0x393   : > { %v723_v36 = vpop.xlane.xlu2 %722  ;;  %v629_v37 = vpop.xlane.xlu0 %628 }
 0x394   : > { %v725_v38 = vsub.f32 %v715_v21, %v723_v36  ;;  %v631_v39 = vsub.f32 %v621_v22, %v629_v37 }
 0x396   : > { %v728_v41 = vmul.f32 1.442695, %v725_v38  ;;  %v634_v42 = vmul.f32 1.442695, %v631_v39 }
 0x398   : > { %1419 = vpow2.f32 %v728_v41 }
 0x399   : > { %1421 = vpow2.f32 %v634_v42 }
 0x39a   : > { %1423 = vpow2.f32 %v632_v43 }
 0x39b   : > { %v813_v44 = vpop.xlane.xlu0 %812 }
 0x39c   : > { %v817_v45 = vsub.f32 %v806_v27, %v813_v44 }
 0x39e   : > { %v1850_v46 = vpop.eup %1419  ;;  %v819_v47 = vmul.f32 1.442695, %v817_v45 }
 0x39f   : > { %v1852_v48 = vpop.eup %1421  ;;  %v733_v49 = vsel %vm530_vm1, %v1850_v46, 0.0 }
 0x3a0   : > { %1425 = vpow2.f32 %v819_v47  ;;  %734 = vadd.xlane.f32.xlu1 %v733_v49  ;;  %v639_v50 = vsel %vm530_vm1, %v1852_v48, 0.0  ;;  %v1858_v52 = vpop.eup %1423 }
 0x3a1   : > { %640 = vadd.xlane.f32.xlu0 %v639_v50  ;;  %v636_v56 = vsel %vm530_vm1, %v1858_v52, 0.0 }
 0x3a3   : > { %v816_v51 = vpop.xlane.xlu2 %815 }
 0x3a4   : > { %v818_v53 = vsub.f32 %v808_v31, %v816_v51 }
 0x3a6   : > { %v1860_v54 = vpop.eup %1425  ;;  %v821_v55 = vmul.f32 1.442695, %v818_v53 }
 0x3a7   : > { %v823_v57 = vsel %vm530_vm1, %v1860_v54, 0.0 }
 0x3a8   : > { %1427 = vpow2.f32 %v821_v55  ;;  %637 = vadd.xlane.f32.xlu1 %v636_v56 }
 0x3a9   : > { %824 = vadd.xlane.f32.xlu0 %v823_v57 }
 0x3ab   : > { %v732_v60 = vpop.xlane.xlu2 %731 }
 0x3ac   : > { %1429 = vrcp.f32 %v732_v60  ;;  %vm741_vm12 = vweird.f32 %v732_v60  ;;  %v745_v23 = vand.u32 2147483647, %v732_v60  ;;  %v747_v24 = vand.u32 2147483648, %v732_v60 }
 0x3ae   : > { %v1866_v58 = vpop.eup %1427  ;;  %v748_v37 = vor.u32 1.1754944e-38, %v747_v24  ;;  %vm746_vm7 = vcmp.eq.f32.partialorder %v745_v23, 8.507059e+37  ;;  %v1300_v23 = vld [vmem:[#allocation8 + $0x20] sm:$0xff] }
 0x3af   : > { %v826_v59 = vsel %vm530_vm1, %v1866_v58, 0.0 }
 0x3b0   : > { %827 = vadd.xlane.f32.xlu2 %v826_v59 }
 0x3b2   : > { %v1430_v62 = vpop.eup %1429 }
 0x3b3   : > { %v737_v0 = vmul.f32 %v1430_v62, %v732_v60  ;;  %vm742_vm10 = vweird.f32 %v1430_v62 }
 0x3b4   : > { %vm1888_vm13 = vmor %vm741_vm12, %vm742_vm10 }
 0x3b5   : > { %v738_v3 = vsub.f32 1.0, %v737_v0 }
 0x3b7   : > { %v739_v7 = vmul.f32 %v1430_v62, %v738_v3 }
 0x3b9   : > { %v740_v12 = vadd.f32 %v1430_v62, %v739_v7 }
 0x3bb   : > { %v744_v26 = vsel %vm1888_vm13, %v1430_v62, %v740_v12 }
 0x3bc   : > { %v749_v44 = vsel %vm746_vm7, %v748_v37, %v744_v26 }
 0x3bd   : > { %767 = vrot.lane.b32.xlu0 %v1818_v30, %s1647_s29  ;;  %v750_v56 = vmul.f32 %v1846_v33, %v749_v44 }
 0x3c1   : > { %674 = vrot.lane.b32.xlu1 %v1818_v30, %s1646_s24 }
 0x3c8   : > { %860 = vrot.lane.b32.xlu2 %v1818_v30, %s1648_s16 }
 0x413   : > { %v735_v61 = vpop.xlane.xlu1 %734 }
 0x414   : > { %1431 = vrcp.f32 %v735_v61  ;;  %v1876_v63 = vpop.xlane.xlu0 %640  ;;  %v760_v16 = vand.u32 2147483647, %v735_v61  ;;  %v762_v19 = vand.u32 2147483648, %v735_v61  ;;  %vm756_vm14 = vweird.f32 %v735_v61 }
 0x415   : > { %1433 = vrcp.f32 %v1876_v63  ;;  %v668_v39 = vand.u32 2147483648, %v1876_v63  ;;  %vm662_vm8 = vweird.f32 %v1876_v63  ;;  %v666_v42 = vand.u32 2147483647, %v1876_v63 }
 0x416   : > { %vm761_vm3 = vcmp.eq.f32.partialorder %v760_v16, 8.507059e+37  ;;  %v763_v29 = vor.u32 1.1754944e-38, %v762_v19  ;;  %v1303_v19 = vld [vmem:[#allocation8 + $0x38] sm:$0xff] }
 0x417   : > { %v669_v53 = vor.u32 1.1754944e-38, %v668_v39  ;;  %981 = vmatpush.bf16.msrb.mxu1 %v1303_v19 }
 0x41a   : > { %v1432_v1 = vpop.eup %1431 }
 0x41b   : > { %v1879_v2 = vpop.eup %1433  ;;  %v752_v4 = vmul.f32 %v1432_v1, %v735_v61  ;;  %v638_v5 = vpop.xlane.xlu1 %637  ;;  %vm757_vm11 = vweird.f32 %v1432_v1  ;;  %982 = vmatpush.bf16.msrb.mxu1 %v1302_v20 }
 0x41c   : > { %1435 = vrcp.f32 %v638_v5  ;;  %v658_v30 = vmul.f32 %v1879_v2, %v1876_v63  ;;  %v1883_v10 = vpop.xlane.xlu0 %824  ;;  %vm1894_vm15 = vmor %vm756_vm14, %vm757_vm11  ;;  %vm663_vm4 = vweird.f32 %v1879_v2  ;;  %v653_v31 = vand.u32 2147483648, %v638_v5 }
 0x41d   : > { %v753_v6 = vsub.f32 1.0, %v752_v4  ;;  %1437 = vrcp.f32 %v1883_v10  ;;  %vm647_vm5 = vweird.f32 %v638_v5  ;;  %v651_v35 = vand.u32 2147483647, %v638_v5  ;;  %vm664_vm9 = vmor %vm662_vm8, %vm663_vm4 }
 0x41e   : > { %v659_v9 = vsub.f32 1.0, %v658_v30  ;;  %v654_v45 = vor.u32 1.1754944e-38, %v653_v31  ;;  %vm667_vm11 = vcmp.eq.f32.partialorder %v666_v42, 8.507059e+37  ;;  %v840_v30 = vand.u32 2147483648, %v1883_v10  ;;  %v1298_v31 = vld [vmem:[#allocation8 + $0x10] sm:$0xff] }
 0x41f   : > { %v754_v8 = vmul.f32 %v1432_v1, %v753_v6  ;;  %vm652_vm10 = vcmp.eq.f32.partialorder %v651_v35, 8.507059e+37 }
 0x420   : > { %v660_v21 = vmul.f32 %v1879_v2, %v659_v9 }
 0x421   : > { %v755_v13 = vadd.f32 %v1432_v1, %v754_v8 }
 0x422   : > { %v1436_v11 = vpop.eup %1435  ;;  %v661_v32 = vadd.f32 %v1879_v2, %v660_v21  ;;  %v1301_v21 = vld [vmem:[#allocation8 + $0x28] sm:$0xff] }
 0x423   : > { %v643_v14 = vmul.f32 %v1436_v11, %v638_v5  ;;  %v1885_v15 = vpop.xlane.xlu2 %827  ;;  %v759_v27 = vsel %vm1894_vm15, %v1432_v1, %v755_v13  ;;  %vm648_vm2 = vweird.f32 %v1436_v11  ;;  %v1438_v36 = vpop.eup %1437  ;;  %983 = vmatpush.bf16.msrb.mxu1 %v1301_v21 }
 0x424   : > { %1439 = vrcp.f32 %v1885_v15  ;;  %v764_v38 = vsel %vm761_vm3, %v763_v29, %v759_v27  ;;  %vm1905_vm6 = vmor %vm647_vm5, %vm648_vm2  ;;  %v665_v50 = vsel %vm664_vm9, %v1879_v2, %v661_v32  ;;  %v830_v51 = vmul.f32 %v1438_v36, %v1883_v10  ;;  %v1299_v29 = vld [vmem:[#allocation8 + $0x18] sm:$0xff]  ;;  %v1297_v32 = vld [vmem:[#allocation8 + $0x8] sm:$0xff] }
 0x425   : > { %v644_v22 = vsub.f32 1.0, %v643_v14  ;;  %v765_v49 = vmul.f32 %v1850_v46, %v764_v38  ;;  %v670_v60 = vsel %vm667_vm11, %v669_v53, %v665_v50  ;;  %v855_v5 = vand.u32 2147483648, %v1885_v15 }
 0x426   : > { %v831_v61 = vsub.f32 1.0, %v830_v51  ;;  %v671_v1 = vmul.f32 %v1852_v48, %v670_v60  ;;  %vm835_vm13 = vweird.f32 %v1438_v36  ;;  %vm849_vm14 = vweird.f32 %v1885_v15 }
 0x427   : > { %v645_v28 = vmul.f32 %v1436_v11, %v644_v22  ;;  %v766_v62 = vpack.c.bf16 %v765_v49, %v750_v56  ;;  %vm834_vm2 = vweird.f32 %v1883_v10  ;;  %v838_v48 = vand.u32 2147483647, %v1883_v10  ;;  %984 = vmatpush.bf16.msrb.mxu1 %v1300_v23 }
 0x428   : > { %v832_v3 = vmul.f32 %v1438_v36, %v831_v61  ;;  %vm836_vm3 = vmor %vm834_vm2, %vm835_vm13  ;;  %v856_v8 = vor.u32 1.1754944e-38, %v855_v5 }
 0x429   : > { %v646_v34 = vadd.f32 %v1436_v11, %v645_v28  ;;  %vm839_vm5 = vcmp.eq.f32.partialorder %v838_v48, 8.507059e+37 }
 0x42a   : > { %v1440_v41 = vpop.eup %1439  ;;  %v833_v6 = vadd.f32 %v1438_v36, %v832_v3 }
 0x42b   : > { %v650_v43 = vsel %vm1905_vm6, %v1436_v11, %v646_v34  ;;  %v845_v47 = vmul.f32 %v1440_v41, %v1885_v15  ;;  %v861_v2 = vpop.permute.xlu2 %860  ;;  %vm850_vm12 = vweird.f32 %v1440_v41  ;;  %v841_v11 = vor.u32 1.1754944e-38, %v840_v30  ;;  %985 = vmatpush.bf16.msrb.mxu1 %v1299_v29  ;;  %v1296_v34 = vld [vmem:[#allocation8] sm:$0xff] }
 0x42c   : > { %v655_v55 = vsel %vm652_vm10, %v654_v45, %v650_v43  ;;  %vm851_vm15 = vmor %vm849_vm14, %vm850_vm12  ;;  %v837_v9 = vsel %vm836_vm3, %v1438_v36, %v833_v6  ;;  %vm909_vm6 = vcmask 785408  }
 0x42d   : > { %v846_v57 = vsub.f32 1.0, %v845_v47  ;;  %v656_v63 = vmul.f32 %v1858_v52, %v655_v55  ;;  %v853_v52 = vand.u32 2147483647, %v1885_v15  ;;  %v842_v13 = vsel %vm839_vm5, %v841_v11, %v837_v9  ;;  %v1408_v55 = vld [vmem:[%s1982_s4] ss:$0 sm:$0xff] }
 0x42e   : > { %v843_v15 = vmul.f32 %v1860_v54, %v842_v13 }
 0x42f   : > { %v768_v59 = vpop.permute.xlu0 %767  ;;  %v847_v0 = vmul.f32 %v1440_v41, %v846_v57  ;;  %v672_v33 = vpack.c.bf16 %v671_v1, %v656_v63  ;;  %vm854_vm4 = vcmp.eq.f32.partialorder %v853_v52, 8.507059e+37  ;;  %986 = vmatpush.bf16.msrb.mxu1 %v1298_v31 }
 0x430   : > { %780 = vmatpush.bf16.msra.mxu2 %v768_v59 }
 0x431   : > { %v848_v4 = vadd.f32 %v1440_v41, %v847_v0 }
 0x433   : > { %1231 = vmatmul.msk.bf16.vlgmr.msra.gmra.mxu2 %vm530_vm1, %v766_v62  ;;  %v675_v46 = vpop.permute.xlu1 %674  ;;  %v852_v7 = vsel %vm851_vm15, %v1440_v41, %v848_v4  ;;  %987 = vmatpush.bf16.msrb.mxu1 %v1297_v32 }
 0x434   : > { %687 = vmatpush.bf16.msrb.mxu0 %v675_v46  ;;  %v857_v12 = vsel %vm854_vm4, %v856_v8, %v852_v7 }
 0x435   : > { %v858_v14 = vmul.f32 %v1866_v58, %v857_v12 }
 0x437   : > { %1229 = vmatmul.msk.bf16.vlgmr.msrb.gmra.mxu0 %vm530_vm1, %v672_v33  ;;  %v859_v16 = vpack.c.bf16 %v858_v14, %v843_v15  ;;  %988 = vmatpush.bf16.msrb.mxu1 %v1296_v34 }
 0x438   : > { %873 = vmatpush.bf16.msra.mxu0 %v861_v2 }
 0x447   : > { %1233 = vmatmul.msk.bf16.vlgmr.msra.gmra.mxu0 %vm530_vm1, %v859_v16  ;;  %vm906_vm1 = vcmask 523264  }
 0x4b4   : > { %v689_v10 = vpop.f32.mrf.mxu0 }
 0x4b6   : > { %v782_v22 = vpop.f32.mrf.mxu2 }
 0x4bc   : > { %v691_v24 = vpop.f32.mrf.mxu0 }
 0x4bd   : > { %v1393_v25 = vpack.i.bf16 %v691_v24, %v689_v10 }
 0x4be   : > { %v784_v26 = vpop.f32.mrf.mxu2 }
 0x4bf   : > { %v1398_v27 = vpack.i.bf16 %v784_v26, %v782_v22  ;;  %1394 = vrot.lane.b32.xlu0 %v1393_v25, %s1648_s16 }
 0x4c1   : > { %1399 = vrot.lane.b32.xlu1 %v1398_v27, %s1647_s29 }
 0x4c4   : > { %v875_v54 = vpop.f32.mrf.mxu0 }
 0x4cc   : > { %v877_v58 = vpop.f32.mrf.mxu0 }
 0x4cd   : > { %v1403_v28 = vpack.i.bf16 %v877_v58, %v875_v54 }
 0x4cf   : > { %1404 = vrot.lane.b32.xlu2 %v1403_v28, %s1646_s24 }
 0x529   : > { %v1405_v36 = vpop.permute.xlu2 %1404 }
 0x52a   : > { %v1407_v44 = vunpack.i.h.bf16 %v1405_v36  ;;  %v1406_v45 = vunpack.i.l.bf16 %v1405_v36 }
 0x531   : > { %v1395_v35 = vpop.permute.xlu0 %1394 }
 0x532   : > { %v1397_v37 = vunpack.i.h.bf16 %v1395_v35  ;;  %v1396_v38 = vunpack.i.l.bf16 %v1395_v35 }
 0x533   : > { %v1400_v39 = vpop.permute.xlu1 %1399 }
 0x534   : > { %v905_v40 = vsel %vm509_vm0, %v1839_v18, %v1397_v37  ;;  %v904_v41 = vsel %vm509_vm0, %v1837_v17, %v1396_v38  ;;  %v1402_v42 = vunpack.i.h.bf16 %v1400_v39  ;;  %v1401_v43 = vunpack.i.l.bf16 %v1400_v39 }
 0x536   : > { %v907_v47 = vsel %vm906_vm1, %v904_v41, %v1401_v43  ;;  %v908_v49 = vsel %vm906_vm1, %v905_v40, %v1402_v42 }
 0x537   : > { %v910_v50 = vsel %vm909_vm6, %v907_v47, %v1406_v45  ;;  %v911_v51 = vsel %vm909_vm6, %v908_v49, %v1407_v44 }
 0x538   : > { %v912_v53 = vpack.c.bf16 %v911_v51, %v910_v50 }
 0x53a   : > { %989 = vmatmul.bf16.vlgmr.msrb.gmra.mxu1 %v912_v53 }
 0x5b7   : > { %v990_v18 = vpop.f32.mrf.mxu1 }
 0x5b8   : > { %v991_v56 = vadd.f32 %v1408_v55, %v990_v18 }
 0x5ba   : > { %995 = vst [vmem:[%s292_s14] sm:$0xff] %v991_v56 }
 0x5bf   : > { %v992_v17 = vpop.f32.mrf.mxu1 }
 0x5c0   : > { %v993_v57 = vadd.f32 %v1408_v55, %v992_v17 }
 0x5c2   : > { %996 = vst [vmem:[%s292_s14 + $0x8] sm:$0xff] %v993_v57 }
 0x5c3   : > { %1588 = shalt.err (!%p1585_p10)
}
 0x5c4   : > { %s1649_s17 = smov 128   ;;  %s1650_s26 = smov 8  }
 0x5c5   : > { %1319 = dma.vmem_to_hbm [thread:$0]  (%p1764_p7), %s1011_s7, 256, %s1013_s15, %s998_s6, %s1649_s17, %s1649_s17, %s1650_s26  }
 0x5c6 PF: > { %s1027_s27 = sand.u32 1, %s1623_s18   ;;  %p1996_p12 = scmp.ge.s32.totalorder %s1635_s21, 2 }
 0x5c7   : > { %s1028_s11 = scalar_lea.sflag [#allocation4], %s1027_s27 }
 0x5c8   : > { %p1336_p13 = pnand %p1996_p12, %p1716_p6 }
 0x5ca   : > { %p1337_p0 = pneg %p1336_p13 }
 0x5cc   : > { %1618 = dma.done.wait (%p1337_p0), %s1028_s11, 256  }
 0x5cd   : > { %1620 = vsyncadd (%p1337_p0), %s1028_s11, 4294967040  ;;  %p20_p3 = scmp.ge.s32.totalorder %s1750_s30, 4   ;;  %s1997_s18 = smov %s1627_s19 }
 0x5ce   : > { %s1998_s19 = smov %s1631_s20  ;;  %s1999_s20 = smov %s1760_s9 }
 0x5cf   : > { %s2000_s21 = smov %s1750_s30  ;;  %22 = sbr.rel (!%p20_p3) target bundleno = 7 (0x7), region = 97 }
 0x5d4   :  { %1034 = vsyncpa [#allocation3], 1 }
 0x5d5   :  { %1036 = vsyncpa [#allocation3 + $0x1], 1 }
 0x5d6   :  { %1037 = vsyncpa [#allocation6], 1 }
 0x5d7   :  { %1038 = vsyncpa [#allocation9], 1 }
 0x5d8   :  { %1039 = vsyncpa [#allocation4], 1 }
 0x5d9   :  { %1041 = vsyncpa [#allocation4 + $0x1], 1 }

</bundles_post_ra>
